<compile_context>
chip_gen: v7x
topology: tpu7x:2x2x1
jax: 0.10.0
libtpu: 0.0.40
codegen_flags: <defaults>
</compile_context>

<pallas_src>
import jax
import jax.numpy as jnp
from jax.experimental import pallas as pl
from jax.experimental.pallas import tpu as pltpu

_SQRT_2_OVER_PI = 0.7978845608028654


def _gelu_tanh(x):
    # TODO(synk): torch.nn.functional.gelu defaults to the exact erf form; the
    # tanh approximation used here differs by <~1e-3 (within the bf16 tolerance).
    return 0.5 * x * (1.0 + jnp.tanh(_SQRT_2_OVER_PI * (x + 0.044715 * x * x * x)))


def _round_up(n, m):
    return ((n + m - 1) // m) * m


def pg_kernel(x_ref, w1_ref, b1_ref, w2_ref, b2_ref, w3_ref, b3_ref, o_ref):
    wdt = w1_ref.dtype  # bf16 (or f32) matmul operand dtype; accum is always f32.

    # linear1 (eval-mode BatchNorm pre-folded into W1/b1) + GELU
    h = jnp.dot(x_ref[...].astype(wdt), w1_ref[...],
                preferred_element_type=jnp.float32) + b1_ref[...]
    h = _gelu_tanh(h)

    # linear2 + ReLU
    h = jnp.dot(h.astype(wdt), w2_ref[...],
                preferred_element_type=jnp.float32) + b2_ref[...]
    h = jnp.maximum(h, 0.0)

    # linear_act + softmax over the (lane) action axis.  Padded action columns
    # carry a -1e30 bias, so exp() underflows to 0 and they don't perturb the sum.
    logits = jnp.dot(h.astype(wdt), w3_ref[...],
                     preferred_element_type=jnp.float32) + b3_ref[...]
    m = jnp.max(logits, axis=-1, keepdims=True)
    e = jnp.exp(logits - m)
    s = jnp.sum(e, axis=-1, keepdims=True)
    # EUP reciprocal + VPU broadcast-mul instead of a per-element divide.
    o_ref[...] = (e * pl.reciprocal(s, approx=False)).astype(o_ref.dtype)


def prepare_params(gamma, beta, running_mean, running_var,
                   w1, b1, w2, b2, w3, b3, *, eps=1e-5, use_bf16=True):
    """One-time parameter prep (outside the hot path):
       fold eval-mode BatchNorm1d into W1/b1, zero-pad hidden/action dims to
       lane-dense multiples of 128, cast matmul weights to bf16 (biases f32).

       w1: [num_inputs, hidden], w2: [hidden, hidden], w3: [hidden, num_actions]
       (weights stored pre-transposed as [in, out])."""
    # TODO(synk): training-mode BatchNorm1d (batch statistics + running-stat
    # updates) is not implemented; eval-mode running-stat normalization is used.
    f32 = jnp.float32
    num_inputs, hidden = w1.shape
    num_actions = w3.shape[1]
    Hd = _round_up(hidden, 128)
    Ac = _round_up(num_actions, 128)

    scale = (gamma / jnp.sqrt(running_var + eps)).astype(f32)
    shift = (beta.astype(f32) - running_mean.astype(f32) * scale)
    w1f = scale[:, None] * w1.astype(f32)            # diag(scale) @ W1
    b1f = shift @ w1.astype(f32) + b1.astype(f32)    # shift @ W1 + b1

    wdt = jnp.bfloat16 if use_bf16 else f32
    w1_p = jnp.zeros((num_inputs, Hd), wdt).at[:, :hidden].set(w1f.astype(wdt))
    b1_p = jnp.zeros((1, Hd), f32).at[0, :hidden].set(b1f)
    w2_p = jnp.zeros((Hd, Hd), wdt).at[:hidden, :hidden].set(w2.astype(wdt))
    b2_p = jnp.zeros((1, Hd), f32).at[0, :hidden].set(b2.astype(f32))
    w3_p = jnp.zeros((Hd, Ac), wdt).at[:hidden, :num_actions].set(w3.astype(wdt))
    # Padded action columns -> -1e30 logits -> ~0 softmax probability.
    b3_p = jnp.full((1, Ac), -1e30, f32).at[0, :num_actions].set(b3.astype(f32))
    return (w1_p, b1_p, w2_p, b2_p, w3_p, b3_p)


def _choose_tb(B, block_b):
    # Multiple of 16 (bf16 sublane packing); capped so the grid keeps >= 2 steps
    # (so the "parallel" batch axis can shard across both TensorCores on v7x).
    tb = min(block_b, _round_up(B, 16))
    if B >= 32:
        tb = min(tb, _round_up((B + 1) // 2, 16))
    return max(tb, 16)


def policy_gradient_forward(state, params, num_actions, *, block_b=512):
    """state: [B, num_inputs] -> [B, num_actions] softmax probabilities."""
    w1_p, b1_p, w2_p, b2_p, w3_p, b3_p = params
    f32 = jnp.float32
    B, num_inputs = state.shape
    Hd = w2_p.shape[0]
    Ac = w3_p.shape[1]

    TB = _choose_tb(B, block_b)
    Bp = _round_up(B, TB)
    x = state.astype(f32)
    if Bp != B:  # batch pad only; feature dim keeps its real lane extent.
        x = jnp.zeros((Bp, num_inputs), f32).at[:B, :].set(x)

    def resident(shape):  # constant index_map -> single-buffered VMEM residence.
        return pl.BlockSpec(shape, lambda i: (0, 0), pipeline_mode=pl.Buffered(1))

    # Explicit VMEM budget: single-buffered weights/biases, double-buffered x/out,
    # f32 intermediates, plus headroom.
    wbytes = (w1_p.size * w1_p.dtype.itemsize + w2_p.size * w2_p.dtype.itemsize
              + w3_p.size * w3_p.dtype.itemsize)
    bbytes = 8 * (2 * Hd + Ac) * 4            # biases, sublane-padded
    iobytes = 2 * TB * (num_inputs + Ac) * 4  # double-buffered x / out tiles
    scratch = TB * (2 * Hd + 2 * Ac) * 4      # in-kernel f32 intermediates
    vmem_limit = int(1.5 * (wbytes + bbytes + iobytes + scratch)) + (8 << 20)
    vmem_limit = min(max(vmem_limit, 32 << 20), 64 << 20)

    out_padded = pl.pallas_call(
        pg_kernel,
        out_shape=jax.ShapeDtypeStruct((Bp, Ac), f32),
        grid_spec=pl.GridSpec(
            grid=(Bp // TB,),
            in_specs=[
                pl.BlockSpec((TB, num_inputs), lambda i: (i, 0)),  # x (batch tiled)
                resident((num_inputs, Hd)),  # W1 (BN folded, bf16)
                resident((1, Hd)),           # b1
                resident((Hd, Hd)),          # W2
                resident((1, Hd)),           # b2
                resident((Hd, Ac)),          # W3
                resident((1, Ac)),           # b3 (-1e30 in padded action lanes)
            ],
            out_specs=pl.BlockSpec((TB, Ac), lambda i: (i, 0)),
        ),
        compiler_params=pltpu.CompilerParams(
            dimension_semantics=("parallel",),
            vmem_limit_bytes=vmem_limit),
    )(x, w1_p, b1_p, w2_p, b2_p, w3_p, b3_p)

    return out_padded[:B, :num_actions]


def _ref_forward(state, gamma, beta, running_mean, running_var,
                 w1, b1, w2, b2, w3, b3, eps=1e-5):
    scale = gamma / jnp.sqrt(running_var + eps)
    shift = beta - running_mean * scale
    xn = state * scale + shift
    h = _gelu_tanh(xn @ w1 + b1)
    h = jnp.maximum(h @ w2 + b2, 0.0)
    return jax.nn.softmax(h @ w3 + b3, axis=-1)


if __name__ == "__main__":
    # Small shapes consistent with the module's forward pass.
    batch = 32
    num_inputs = 16
    hidden_size = 32
    num_actions = 8

    key = jax.random.PRNGKey(0)
    (kx, kg, kb, km, kv, kw1, kb1, kw2, kb2, kw3, kb3) = jax.random.split(key, 11)

    state = jax.random.normal(kx, (batch, num_inputs), jnp.float32)

    # BatchNorm1d parameters / running stats.
    gamma = jax.random.uniform(kg, (num_inputs,), jnp.float32, 0.5, 1.5)
    beta = 0.1 * jax.random.normal(kb, (num_inputs,), jnp.float32)
    running_mean = 0.1 * jax.random.normal(km, (num_inputs,), jnp.float32)
    running_var = jax.random.uniform(kv, (num_inputs,), jnp.float32, 0.5, 1.5)

    # nn.Linear-style init (uniform(-1/sqrt(fan_in), 1/sqrt(fan_in))),
    # weights stored pre-transposed as [in, out].
    def linear_init(kw, kb_, fan_in, fan_out):
        bound = 1.0 / float(fan_in) ** 0.5
        w = jax.random.uniform(kw, (fan_in, fan_out), jnp.float32, -bound, bound)
        b = jax.random.uniform(kb_, (fan_out,), jnp.float32, -bound, bound)
        return w, b

    w1, b1 = linear_init(kw1, kb1, num_inputs, hidden_size)
    w2, b2 = linear_init(kw2, kb2, hidden_size, hidden_size)
    w3, b3 = linear_init(kw3, kb3, hidden_size, num_actions)

    # One-time parameter prep (BN fold + padding + bf16 cast), outside the hot path.
    params = prepare_params(gamma, beta, running_mean, running_var,
                            w1, b1, w2, b2, w3, b3, use_bf16=True)

    # block_b=16 so the demo exercises a 2-step batch grid (grid=(2,)).
    out = policy_gradient_forward(state, params, num_actions, block_b=16)
    out = jax.block_until_ready(out)

    ref = _ref_forward(state, gamma, beta, running_mean, running_var,
                       w1, b1, w2, b2, w3, b3)

    assert out.shape == (batch, num_actions)
    # bf16 matmul operands -> relaxed tolerance vs the f32 reference.
    assert jnp.allclose(out, ref, atol=2e-2, rtol=2e-2), float(jnp.max(jnp.abs(out - ref)))
    assert jnp.allclose(out.sum(axis=-1), 1.0, atol=1e-5)

    print("KERNEL_OK")
</pallas_src>

<mosaic_0001>
module attributes {stable_mosaic.version = 11 : i64} {
  func.func @pg_kernel(%arg0: i32, %arg1: memref<16x16xf32, #tpu.memory_space<vmem>>, %arg2: memref<16x128xbf16, #tpu.memory_space<vmem>>, %arg3: memref<1x128xf32, #tpu.memory_space<vmem>>, %arg4: memref<128x128xbf16, #tpu.memory_space<vmem>>, %arg5: memref<1x128xf32, #tpu.memory_space<vmem>>, %arg6: memref<128x128xbf16, #tpu.memory_space<vmem>>, %arg7: memref<1x128xf32, #tpu.memory_space<vmem>>, %arg8: memref<16x128xf32, #tpu.memory_space<vmem>>) attributes {dimension_semantics = [#tpu.dimension_semantics<parallel>], iteration_bounds = array<i64: 2>, scalar_prefetch = 0 : i64, scratch_operands = 0 : i64, tpu.core_type = #tpu.core_type<tc>, window_params = [{transform_indices = @transform_0, window_bounds = array<i64: 16, 16>}, {pipeline_mode = #tpu.pipeline_mode<synchronous>, transform_indices = @transform_1, window_bounds = array<i64: 16, 128>}, {pipeline_mode = #tpu.pipeline_mode<synchronous>, transform_indices = @transform_2, window_bounds = array<i64: 1, 128>}, {pipeline_mode = #tpu.pipeline_mode<synchronous>, transform_indices = @transform_3, window_bounds = array<i64: 128, 128>}, {pipeline_mode = #tpu.pipeline_mode<synchronous>, transform_indices = @transform_4, window_bounds = array<i64: 1, 128>}, {pipeline_mode = #tpu.pipeline_mode<synchronous>, transform_indices = @transform_5, window_bounds = array<i64: 128, 128>}, {pipeline_mode = #tpu.pipeline_mode<synchronous>, transform_indices = @transform_6, window_bounds = array<i64: 1, 128>}, {transform_indices = @transform_7, window_bounds = array<i64: 16, 128>}]} {
    %c0 = arith.constant 0 : index
    %c0_0 = arith.constant 0 : index
    %0 = vector.load %arg1[%c0, %c0_0] : memref<16x16xf32, #tpu.memory_space<vmem>>, vector<16x16xf32>
    %1 = arith.truncf %0 : vector<16x16xf32> to vector<16x16xbf16>
    %c0_1 = arith.constant 0 : index
    %c0_2 = arith.constant 0 : index
    %2 = vector.load %arg2[%c0_1, %c0_2] : memref<16x128xbf16, #tpu.memory_space<vmem>>, vector<16x128xbf16>
    %cst = arith.constant dense<0.000000e+00> : vector<16x128xf32>
    %3 = tpu.matmul %1, %2, %cst {dimension_numbers = #tpu.dot_dimension_numbers<[1], [0], [0], [1], [0, 0, 1, 1], [], []>} : vector<16x16xbf16>, vector<16x128xbf16>, vector<16x128xf32> -> vector<16x128xf32>
    %c0_3 = arith.constant 0 : index
    %c0_4 = arith.constant 0 : index
    %4 = vector.load %arg3[%c0_3, %c0_4] : memref<1x128xf32, #tpu.memory_space<vmem>>, vector<1x128xf32>
    %5 = vector.broadcast %4 : vector<1x128xf32> to vector<16x128xf32>
    %6 = arith.addf %3, %5 : vector<16x128xf32>
    %cst_5 = arith.constant 5.000000e-01 : f32
    %7 = vector.broadcast %cst_5 : f32 to vector<16x128xf32>
    %8 = arith.mulf %7, %6 : vector<16x128xf32>
    %cst_6 = arith.constant 4.471500e-02 : f32
    %9 = vector.broadcast %cst_6 : f32 to vector<16x128xf32>
    %10 = arith.mulf %9, %6 : vector<16x128xf32>
    %11 = arith.mulf %10, %6 : vector<16x128xf32>
    %12 = arith.mulf %11, %6 : vector<16x128xf32>
    %13 = arith.addf %6, %12 : vector<16x128xf32>
    %cst_7 = arith.constant 0.797884583 : f32
    %14 = vector.broadcast %cst_7 : f32 to vector<16x128xf32>
    %15 = arith.mulf %14, %13 : vector<16x128xf32>
    %16 = math.tanh %15 : vector<16x128xf32>
    %cst_8 = arith.constant 1.000000e+00 : f32
    %17 = vector.broadcast %cst_8 : f32 to vector<16x128xf32>
    %18 = arith.addf %17, %16 : vector<16x128xf32>
    %19 = arith.mulf %8, %18 : vector<16x128xf32>
    %20 = arith.truncf %19 : vector<16x128xf32> to vector<16x128xbf16>
    %c0_9 = arith.constant 0 : index
    %c0_10 = arith.constant 0 : index
    %21 = vector.load %arg4[%c0_9, %c0_10] : memref<128x128xbf16, #tpu.memory_space<vmem>>, vector<128x128xbf16>
    %cst_11 = arith.constant dense<0.000000e+00> : vector<16x128xf32>
    %22 = tpu.matmul %20, %21, %cst_11 {dimension_numbers = #tpu.dot_dimension_numbers<[1], [0], [0], [1], [0, 0, 1, 1], [], []>} : vector<16x128xbf16>, vector<128x128xbf16>, vector<16x128xf32> -> vector<16x128xf32>
    %c0_12 = arith.constant 0 : index
    %c0_13 = arith.constant 0 : index
    %23 = vector.load %arg5[%c0_12, %c0_13] : memref<1x128xf32, #tpu.memory_space<vmem>>, vector<1x128xf32>
    %24 = vector.broadcast %23 : vector<1x128xf32> to vector<16x128xf32>
    %25 = arith.addf %22, %24 : vector<16x128xf32>
    %cst_14 = arith.constant 0.000000e+00 : f32
    %26 = vector.broadcast %cst_14 : f32 to vector<16x128xf32>
    %27 = arith.maximumf %25, %26 : vector<16x128xf32>
    %28 = arith.truncf %27 : vector<16x128xf32> to vector<16x128xbf16>
    %c0_15 = arith.constant 0 : index
    %c0_16 = arith.constant 0 : index
    %29 = vector.load %arg6[%c0_15, %c0_16] : memref<128x128xbf16, #tpu.memory_space<vmem>>, vector<128x128xbf16>
    %cst_17 = arith.constant dense<0.000000e+00> : vector<16x128xf32>
    %30 = tpu.matmul %28, %29, %cst_17 {dimension_numbers = #tpu.dot_dimension_numbers<[1], [0], [0], [1], [0, 0, 1, 1], [], []>} : vector<16x128xbf16>, vector<128x128xbf16>, vector<16x128xf32> -> vector<16x128xf32>
    %c0_18 = arith.constant 0 : index
    %c0_19 = arith.constant 0 : index
    %31 = vector.load %arg7[%c0_18, %c0_19] : memref<1x128xf32, #tpu.memory_space<vmem>>, vector<1x128xf32>
    %32 = vector.broadcast %31 : vector<1x128xf32> to vector<16x128xf32>
    %33 = arith.addf %30, %32 : vector<16x128xf32>
    %cst_20 = arith.constant dense<0xFF800000> : vector<16xf32>
    %34 = vector.multi_reduction <maximumf>, %33, %cst_20 [1] : vector<16x128xf32> to vector<16xf32>
    %35 = vector.shape_cast %34 : vector<16xf32> to vector<16x1xf32>
    %36 = vector.broadcast %35 : vector<16x1xf32> to vector<16x128xf32>
    %37 = arith.subf %33, %36 : vector<16x128xf32>
    %38 = math.exp %37 : vector<16x128xf32>
    %cst_21 = arith.constant dense<0.000000e+00> : vector<16xf32>
    %39 = vector.multi_reduction <add>, %38, %cst_21 [1] : vector<16x128xf32> to vector<16xf32>
    %40 = vector.shape_cast %39 : vector<16xf32> to vector<16x1xf32>
    %41 = tpu.reciprocal %40 : vector<16x1xf32> -> vector<16x1xf32>
    %42 = vector.broadcast %41 : vector<16x1xf32> to vector<16x128xf32>
    %43 = arith.mulf %38, %42 : vector<16x128xf32>
    %c0_22 = arith.constant 0 : index
    %c0_23 = arith.constant 0 : index
    %44 = vector.load %arg8[%c0_22, %c0_23] : memref<16x128xf32, #tpu.memory_space<vmem>>, vector<16x128xf32>
    tpu.vector_store %arg8[%c0_22, %c0_23], %43 {strides = array<i32>} : memref<16x128xf32, #tpu.memory_space<vmem>>, vector<16x128xf32>,
    return
  }
  func.func @transform_0(%arg0: i32) -> (i32, i32) {
    %c0_i32 = arith.constant 0 : i32
    %c0_i32_0 = arith.constant 0 : i32
    return %arg0, %c0_i32 : i32, i32
  }
  func.func @transform_1(%arg0: i32) -> (i32, i32) {
    %c0_i32 = arith.constant 0 : i32
    %c0_i32_0 = arith.constant 0 : i32
    %c0_i32_1 = arith.constant 0 : i32
    return %c0_i32, %c0_i32_0 : i32, i32
  }
  func.func @transform_2(%arg0: i32) -> (i32, i32) {
    %c0_i32 = arith.constant 0 : i32
    %c0_i32_0 = arith.constant 0 : i32
    %c0_i32_1 = arith.constant 0 : i32
    return %c0_i32, %c0_i32_0 : i32, i32
  }
  func.func @transform_3(%arg0: i32) -> (i32, i32) {
    %c0_i32 = arith.constant 0 : i32
    %c0_i32_0 = arith.constant 0 : i32
    %c0_i32_1 = arith.constant 0 : i32
    return %c0_i32, %c0_i32_0 : i32, i32
  }
  func.func @transform_4(%arg0: i32) -> (i32, i32) {
    %c0_i32 = arith.constant 0 : i32
    %c0_i32_0 = arith.constant 0 : i32
    %c0_i32_1 = arith.constant 0 : i32
    return %c0_i32, %c0_i32_0 : i32, i32
  }
  func.func @transform_5(%arg0: i32) -> (i32, i32) {
    %c0_i32 = arith.constant 0 : i32
    %c0_i32_0 = arith.constant 0 : i32
    %c0_i32_1 = arith.constant 0 : i32
    return %c0_i32, %c0_i32_0 : i32, i32
  }
  func.func @transform_6(%arg0: i32) -> (i32, i32) {
    %c0_i32 = arith.constant 0 : i32
    %c0_i32_0 = arith.constant 0 : i32
    %c0_i32_1 = arith.constant 0 : i32
    return %c0_i32, %c0_i32_0 : i32, i32
  }
  func.func @transform_7(%arg0: i32) -> (i32, i32) {
    %c0_i32 = arith.constant 0 : i32
    %c0_i32_0 = arith.constant 0 : i32
    return %arg0, %c0_i32 : i32, i32
  }
}

</mosaic_0001>

<bundles_post_ra>
// kernel: tpu_custom_call.1
= control target key start
LH: loop header
LB: loop body
LE: loop exit
PB: predicated region body
PF: predicated region fallthrough
CT: control target
= control target key end

     0   :  { %12 = vsyncpa [#allocation3], 0  ;;  %s1344_s0 = inlined_call_operand.vmem [shape: f32[32,16], index: 0, kind: input, shape index: {}]   ;;  %s1345_s1 = inlined_call_operand.hbm [shape: bf16[16,128], index: 1, kind: input, shape index: {}]   ;;  %s1346_s2 = inlined_call_operand.vmem [shape: f32[1,128], index: 2, kind: input, shape index: {}]   ;;  %s1347_s3 = inlined_call_operand.hbm [shape: bf16[128,128], index: 3, kind: input, shape index: {}]   ;;  %s1348_s4 = inlined_call_operand.vmem [shape: f32[1,128], index: 4, kind: input, shape index: {}]   ;;  %s1349_s5 = inlined_call_operand.vmem [shape: bf16[128,128], index: 5, kind: input, shape index: {}]   ;;  %s1350_s6 = inlined_call_operand.vmem [shape: f32[1,128], index: 6, kind: input, shape index: {}]   ;;  %s1351_s7 = inlined_call_operand.hbm [shape: f32[32,128], index: 7, kind: output, shape index: {}]  }
   0x1   :  { %13 = vsyncpa [#allocation6], 0 }
   0x2   :  { %14 = vsyncpa [#allocation4], 0 }
   0x3   :  { %16 = vsyncpa [#allocation4 + $0x1], 0  ;;  %s1114_s24 = smov 0   ;;  %s1116_s25 = smov 0  }
   0x4   :  { %s1118_s26 = smov 0   ;;  %s1120_s27 = smov 0  }
   0x5 LB: > { %s1135_s28 = sadd.s32 4294967295, %s1063_s27   ;;  %s738_s29 = sadd.s32 4294967294, %s1063_s27   ;;  %s1063_s27 = sphi %s1120_s27, %s1371_s27   ;;  %s1059_s26 = sphi %s1118_s26, %s1370_s26   ;;  %s1055_s25 = sphi %s1116_s25, %s1369_s25   ;;  %s1051_s24 = sphi %s1114_s24, %s1368_s24  }
   0x6   : > { %s1139_s30 = sadd.s32 1, %s1063_s27   ;;  %s181_s8 = sadd.s32 1, %s1059_s26 }
   0x7   : > { %s178_s9 = ssub.s32 %s1063_s27, %s1139_s30  ;;  %p191_p0 = scmp.ne.s32.totalorder %s1059_s26, %s1055_s25 }
   0x8   : > { %p179_p1 = scmp.eq.s32.totalorder %s178_s9, 0  ;;  %p192_p2 = scmp.eq.s32.totalorder %s1135_s28, 1 }
   0x9   : > { %p197_p3 = scmp.ne.s32.totalorder %s1055_s25, %s1051_s24  ;;  %p198_p4 = scmp.eq.s32.totalorder %s738_s29, 1 }
   0xa   : > { %s1150_s10 = scalar_select %p179_p1, %s1059_s26, %s181_s8  }
   0xb   : > { %p1152_p5 = por %p192_p2, %p191_p0  ;;  %p1156_p6 = por %p198_p4, %p197_p3 }
   0xc   : > { %1355 = sst [smem:[#allocation11_spill]] %s1150_s10  ;;  %p739_p7 = scmp.ge.s32.totalorder %s1063_s27, 1 }
   0xd   : > { %s1356_s11 = scalar_select %p1152_p5, 1, 0 }
   0xe   : > { %s1357_s12 = scalar_select %p1156_p6, 1, 0 }
   0xf   : > { %p205_p8 = scmp.lt.s32.totalorder %s1063_s27, 3  ;;  %p1352_p9 = scmp.eq.s32.totalorder %s1135_s28, 0 }
  0x10   : > { %s1065_s14 = smov [#allocation2]   ;;  %s1066_s17 = smov [#allocation5]  }
  0x11   : > { %p1163_p10 = pnand %p739_p7, %p205_p8  ;;  %s217_s15 = sshll.u32 %s1065_s14, 4  ;;  %s218_s15 = int_to_ptr.vmem [resolvable:$true] %s217_s15 }
  0x12   : > { %s233_s18 = sshll.u32 %s1066_s17, 4  ;;  %s937_s21 = scalar_lea.hbm %s1345_s1, 128  ;;  %s1175_s18 = int_to_ptr.vmem [resolvable:$true] %s233_s18 }
  0x13   : > { %s1358_s13 = scalar_select %p1163_p10, 1, 0 }
  0x14   : > { %p852_p11 = pneg %p1163_p10  ;;  %p938_p13 = scmp.ne.s32.totalorder %s1345_s1, %s937_s21 }
  0x15   : > { %p944_p3 = scmp.lt.u32.totalorder %s937_s21, %s1345_s1 }
  0x16   : > { %p1171_p12 = pnand %p1352_p9, %p852_p11 }
  0x18   : > { %p939_p0 = pneg %p1171_p12 }
  0x1a   : > { %p940_p1 = pnand %p939_p0, %p938_p13 }
  0x1c   : > { %p941_p2 = pneg %p940_p1 }
  0x1e   : > { %p946_p4 = pnand %p944_p3, %p941_p2 }
  0x20   : > { %949 = shalt.err (!%p946_p4)
}
  0x21   : > { %s950_s9 = scalar_lea.vmem %s218_s15, 128  ;;  %p958_p9 = scmp.lt.s32.totalorder %s218_s15, %s218_s15 }
  0x22   : > { %p951_p7 = scmp.ne.s32.totalorder %s218_s15, %s950_s9  ;;  %p959_p6 = scmp.lt.s32.totalorder %s950_s9, %s950_s9 }
  0x24   : > { %p953_p8 = pnand %p951_p7, %p939_p0  ;;  %p960_p5 = por %p959_p6, %p958_p9 }
  0x26   : > { %p954_p11 = pneg %p953_p8 }
  0x28   : > { %p961_p10 = pnand %p960_p5, %p954_p11 }
  0x2a   : > { %964 = shalt.err (!%p961_p10)
}
  0x2b   : > { %s1067_s14 = smov 64   ;;  %s1068_s17 = smov 4  }
  0x2c   : > { %855 = dma.hbm_to_vmem [thread:$0]  (!%p1171_p12), %s1345_s1, 128, %s218_s15, [#allocation3], %s1067_s14, %s1067_s14, %s1068_s17  }
  0x2d   : > { %s965_s23 = scalar_lea.hbm %s1347_s3, 1024 }
  0x2e   : > { %p966_p13 = scmp.ne.s32.totalorder %s1347_s3, %s965_s23  ;;  %p972_p9 = scmp.lt.u32.totalorder %s965_s23, %s1347_s3 }
  0x30   : > { %p968_p5 = pnand %p966_p13, %p939_p0 }
  0x32   : > { %p969_p6 = pneg %p968_p5 }
  0x34   : > { %p974_p10 = pnand %p972_p9, %p969_p6 }
  0x36   : > { %977 = shalt.err (!%p974_p10)
}
  0x37   : > { %s978_s15 = scalar_lea.vmem %s1175_s18, 1024  ;;  %p986_p4 = scmp.lt.s32.totalorder %s1175_s18, %s1175_s18 }
  0x38   : > { %p979_p1 = scmp.ne.s32.totalorder %s1175_s18, %s978_s15  ;;  %p987_p7 = scmp.lt.s32.totalorder %s978_s15, %s978_s15 }
  0x3a   : > { %p981_p2 = pnand %p979_p1, %p939_p0  ;;  %p988_p8 = por %p987_p7, %p986_p4 }
  0x3c   : > { %p982_p3 = pneg %p981_p2 }
  0x3e   : > { %p989_p11 = pnand %p988_p8, %p982_p3 }
  0x40   : > { %992 = shalt.err (!%p989_p11)
}
  0x41   : > { %858 = dma.hbm_to_vmem [thread:$0]  (!%p1171_p12), %s1347_s3, 1024, %s1175_s18, [#allocation6], %s1067_s14, %s1067_s14, %s1068_s17  }
  0x42   : > { %p1360_p13 = scmp.ne.s32.totalorder %s1358_s13, 0 }
  0x43   : > { %p1361_p5 = scmp.eq.s32.totalorder (!%p1360_p13), %s1135_s28, 0 }
  0x44   : > { %267 = sbr.rel (%p1360_p13) target bundleno = 1097 (0x449), region = 48 }
  0x4b   : > { %1038 = dma.done.wait (%p1361_p5), [#allocation3], 128   ;;  %p1362_p0 = pmov %p1361_p5 }
  0x4d   : > { %1040 = vsyncadd (%p1362_p0), [#allocation3], 4294967168  ;;  %p1363_p6 = pmov %p1362_p0 }
  0x4e   : > { %p1364_p9 = pmov %p1362_p0 }
  0x4f   : > { %1042 = dma.done.wait (%p1363_p6), [#allocation6], 1024  }
  0x50   : > { %1044 = vsyncadd (%p1364_p9), [#allocation6], 4294966272  ;;  %s747_s16 = sshll.u32 %s1135_s28, 1  ;;  %v1069_v0 = vmov 0.0   ;;  %vm1070_vm0 = vmmov 0   ;;  %v908_v1 = vld [vmem:[#allocation2] sm:$0xff]  }
  0x51   : > { %796 = vmatprep.subr.bf16.mxu0 %v1069_v0  ;;  %798 = vmatprep.mubr.msk.bf16.mxu0 %vm1070_vm0, %v1069_v0  ;;  %p304_p12 = scmp.lt.s32.totalorder %s747_s16, 3  ;;  %vm329_vm1 = vcmask 130048   ;;  %v909_v5 = vld [vmem:[#allocation5] sm:$0xff]   ;;  %v910_v6 = vld [vmem:[#allocation5 + $0x8] sm:$0xff]   ;;  %v911_v7 = vld [vmem:[#allocation5 + $0x10] sm:$0xff]   ;;  %s300_s15 = sand.u32 1, %s1055_s25  }
  0x52   : > { %802 = vmatprep.subr.bf16.mxu1 %v1069_v0  ;;  %818 = vmatprep.mubr.msk.bf16.mxu1 %vm1070_vm0, %v1069_v0  ;;  %v912_v8 = vld [vmem:[#allocation5 + $0x18] sm:$0xff]   ;;  %v913_v9 = vld [vmem:[#allocation5 + $0x20] sm:$0xff]   ;;  %v914_v10 = vld [vmem:[#allocation5 + $0x28] sm:$0xff]   ;;  %s746_s10 = sshll.u32 %s300_s15, 4  ;;  %s775_s19 = sshll.u32 %s1135_s28, 8 }
  0x53   : > { %s1373_s16 = smov (!%p304_p12, %s747_s16), 3  ;;  %797 = vmatpush3.bf16.msra.mxu0 %v908_v1  ;;  %803 = vmatpush3.bf16.msra.mxu1 %v909_v5  ;;  %v915_v11 = vld [vmem:[#allocation5 + $0x30] sm:$0xff]   ;;  %v916_v12 = vld [vmem:[#allocation5 + $0x38] sm:$0xff]   ;;  %v918_v14 = vld [vmem:[%s1349_s5 + $0x8] sm:$0xff]   ;;  %s1303_s20 = scalar_lea.sflag [#allocation4], %s300_s15 }
  0x54   : > { %s748_s13 = sshll.u32 %s1373_s16, 3  ;;  %822 = vmatprep.subr.bf16.mxu0 %v1069_v0  ;;  %804 = vmatprep.subr.bf16.mxu1 %v1069_v0  ;;  %v917_v13 = vld [vmem:[%s1349_s5] sm:$0xff]   ;;  %v919_v15 = vld [vmem:[%s1349_s5 + $0x10] sm:$0xff]   ;;  %v920_v16 = vld [vmem:[%s1349_s5 + $0x18] sm:$0xff]   ;;  %s302_s16 = scalar_lea.vmem [#allocation7], %s746_s10 }
  0x55   : > { %s307_s17 = scalar_lea.vmem %s1344_s0, %s748_s13  ;;  %v921_v17 = vld [vmem:[%s1349_s5 + $0x20] sm:$0xff]   ;;  %v922_v18 = vld [vmem:[%s1349_s5 + $0x28] sm:$0xff]   ;;  %v923_v45 = vld [vmem:[%s1349_s5 + $0x30] sm:$0xff]   ;;  %s654_s13 = sshll.u32 %s302_s16, 4  ;;  %s1301_s13 = int_to_ptr.vmem [resolvable:$true] %s654_s13 }
  0x56   : > { %v311_v2 = vld [vmem:[%s307_s17] sm:$0xff]  ;;  %v312_v3 = vld [vmem:[%s307_s17 + $0x8] sm:$0xff]  ;;  %v924_v46 = vld [vmem:[%s1349_s5 + $0x38] sm:$0xff]   ;;  %s1299_s17 = scalar_lea.hbm %s1351_s7, %s775_s19  ;;  %s993_s21 = scalar_lea.vmem %s1301_s13, 256 }
  0x57   : > { %v313_v4 = vpack.c.bf16 %v312_v3, %v311_v2  ;;  %805 = vmatpush3.bf16.msra.mxu1 %v910_v6  ;;  %v749_v19 = vld [vmem:[%s1346_s2] ss:$0 sm:$0xff]  ;;  %p994_p10 = scmp.ne.s32.totalorder %s1301_s13, %s993_s21  ;;  %p1365_p1 = scmp.ne.s32.totalorder %s1356_s11, 0 }
  0x58   : > { %806 = vmatprep.subr.bf16.mxu1 %v1069_v0  ;;  %v752_v47 = vld [vmem:[%s1348_s4] ss:$0 sm:$0xff]  ;;  %s1071_s28 = smov [#allocation7]  }
  0x59   : > { %799 = vmatmul.mubr.msk.bf16.vlgmr.msra.gmra.mrb[0].mxu0 %vm329_vm1, %v313_v4  ;;  %v761_v57 = vld [vmem:[%s1350_s6] ss:$0 sm:$0xff]  ;;  %p995_p2 = pnand %p994_p10, %p1365_p1  ;;  %s997_s22 = sshll.u32 %s1071_s28, 4  ;;  %s998_s22 = int_to_ptr.vmem [resolvable:$false] %s997_s22 }
  0x5a   : > { %838 = vmatprep.mubr.msk.bf16.mxu0 %vm1070_vm0, %v1069_v0  ;;  %823 = vmatpush3.bf16.msra.mxu0 %v917_v13  ;;  %s999_s23 = scalar_lea.vmem %s998_s22, 512  ;;  %p1000_p4 = scmp.lt.s32.totalorder %s1301_s13, %s998_s22 }
  0x5b   : > { %807 = vmatpush3.bf16.msra.mxu1 %v911_v7  ;;  %824 = vmatprep.subr.bf16.mxu0 %v1069_v0  ;;  %p996_p3 = pneg %p995_p2  ;;  %p1001_p7 = scmp.lt.s32.totalorder %s999_s23, %s993_s21 }
  0x5c   : > { %808 = vmatprep.subr.bf16.mxu1 %v1069_v0 }
  0x5d   : > { %p1002_p8 = por %p1001_p7, %p1000_p4 }
  0x5e   : > { %825 = vmatpush3.bf16.msra.mxu0 %v918_v14 }
  0x5f   : > { %809 = vmatpush3.bf16.msra.mxu1 %v912_v8  ;;  %826 = vmatprep.subr.bf16.mxu0 %v1069_v0  ;;  %p1003_p11 = pnand %p1002_p8, %p996_p3 }
  0x60   : > { %810 = vmatprep.subr.bf16.mxu1 %v1069_v0 }
  0x62   : > { %827 = vmatpush3.bf16.msra.mxu0 %v919_v15 }
  0x63   : > { %811 = vmatpush3.bf16.msra.mxu1 %v913_v9  ;;  %828 = vmatprep.subr.bf16.mxu0 %v1069_v0 }
  0x64   : > { %812 = vmatprep.subr.bf16.mxu1 %v1069_v0 }
  0x66   : > { %829 = vmatpush3.bf16.msra.mxu0 %v920_v16 }
  0x67   : > { %813 = vmatpush3.bf16.msra.mxu1 %v914_v10  ;;  %830 = vmatprep.subr.bf16.mxu0 %v1069_v0 }
  0x68   : > { %814 = vmatprep.subr.bf16.mxu1 %v1069_v0 }
  0x6a   : > { %831 = vmatpush3.bf16.msra.mxu0 %v921_v17 }
  0x6b   : > { %815 = vmatpush3.bf16.msra.mxu1 %v915_v11  ;;  %832 = vmatprep.subr.bf16.mxu0 %v1069_v0 }
  0x6c   : > { %816 = vmatprep.subr.bf16.mxu1 %v1069_v0 }
  0x6e   : > { %833 = vmatpush3.bf16.msra.mxu0 %v922_v18 }
  0x6f   : > { %817 = vmatpush3.bf16.msra.mxu1 %v916_v12  ;;  %834 = vmatprep.subr.bf16.mxu0 %v1069_v0 }
  0x72   : > { %835 = vmatpush3.bf16.msra.mxu0 %v923_v45 }
  0x73   : > { %836 = vmatprep.subr.bf16.mxu0 %v1069_v0 }
  0x76   : > { %837 = vmatpush3.bf16.msra.mxu0 %v924_v46 }
 0x12c   : > { %v367_v20 = vpop.f32.mrb[0].mxu0 }
 0x12d   : > { %v368_v21 = vadd.f32 %v749_v19, %v367_v20  ;;  %v800_v22 = vpop.f32.mrb[1].mxu0 }
 0x12e   : > { %v370_v23 = vpop.f32.mrb[2].mxu0 }
 0x12f   : > { %v376_v24 = vmul.f32 0.044715, %v368_v21  ;;  %v371_v25 = vadd.f32 %v749_v19, %v370_v23  ;;  %v801_v26 = vpop.f32.mrb[3].mxu0  ;;  %v374_v39 = vmul.f32 0.5, %v368_v21 }
 0x131   : > { %v378_v27 = vmul.f32 %v376_v24, %v368_v21  ;;  %v377_v28 = vmul.f32 0.044715, %v371_v25  ;;  %v375_v40 = vmul.f32 0.5, %v371_v25 }
 0x133   : > { %v380_v29 = vmul.f32 %v378_v27, %v368_v21  ;;  %v379_v30 = vmul.f32 %v377_v28, %v371_v25 }
 0x135   : > { %v381_v31 = vmul.f32 %v379_v30, %v371_v25  ;;  %v382_v32 = vadd.f32 %v380_v29, %v368_v21 }
 0x137   : > { %v383_v33 = vadd.f32 %v381_v31, %v371_v25  ;;  %v384_v34 = vmul.f32 0.7978846, %v382_v32 }
 0x139   : > { %v385_v35 = vmul.f32 0.7978846, %v383_v33  ;;  %925 = vtanh.f32 %v384_v34 }
 0x13b   : > { %927 = vtanh.f32 %v385_v35 }
 0x143   : > { %v926_v36 = vpop.eup %925 }
 0x144   : > { %v388_v37 = vadd.f32 1.0, %v926_v36 }
 0x145   : > { %v928_v38 = vpop.eup %927 }
 0x146   : > { %v389_v41 = vadd.f32 1.0, %v928_v38  ;;  %v390_v42 = vmul.f32 %v388_v37, %v374_v39 }
 0x148   : > { %v391_v43 = vmul.f32 %v389_v41, %v375_v40 }
 0x14a   : > { %v392_v44 = vpack.c.bf16 %v391_v43, %v390_v42 }
 0x14c   : > { %819 = vmatmul.mubr.bf16.vlgmr.msra.gmra.mrb[0].mxu1 %v392_v44 }
 0x21f   : > { %v498_v48 = vpop.f32.mrb[0].mxu1 }
 0x220   : > { %v499_v49 = vadd.f32 %v752_v47, %v498_v48  ;;  %v820_v50 = vpop.f32.mrb[1].mxu1 }
 0x221   : > { %v501_v51 = vpop.f32.mrb[2].mxu1 }
 0x222   : > { %v502_v52 = vadd.f32 %v752_v47, %v501_v51  ;;  %v821_v53 = vpop.f32.mrb[3].mxu1  ;;  %v505_v54 = vmax.f32 %v499_v49, 0.0 }
 0x224   : > { %v506_v55 = vmax.f32 %v502_v52, 0.0 }
 0x226   : > { %v507_v56 = vpack.c.bf16 %v506_v55, %v505_v54 }
 0x228   : > { %839 = vmatmul.mubr.bf16.vlgmr.msra.gmra.mrb[4].mxu0 %v507_v56 }
 0x2fb   : > { %v613_v58 = vpop.f32.mrb[4].mxu0 }
 0x2fc   : > { %v614_v59 = vadd.f32 %v761_v57, %v613_v58  ;;  %v840_v60 = vpop.f32.mrb[5].mxu0 }
 0x2fd   : > { %v616_v61 = vpop.f32.mrb[6].mxu0 }
 0x2fe   : > { %620 = vmax.xlane.f32.xlu0 %v614_v59  ;;  %v841_v62 = vpop.f32.mrb[7].mxu0  ;;  %v617_v63 = vadd.f32 %v761_v57, %v616_v61 }
 0x302   : > { %622 = vmax.xlane.f32.xlu0 %v617_v63 }
 0x38b   : > { %v621_v0 = vpop.xlane.xlu0 %620 }
 0x38c   : > { %v624_v1 = vsub.f32 %v614_v59, %v621_v0 }
 0x38e   : > { %v626_v2 = vmul.f32 1.442695, %v624_v1 }
 0x38f   : > { %v623_v3 = vpop.xlane.xlu0 %622 }
 0x390   : > { %929 = vpow2.f32 %v626_v2  ;;  %v625_v4 = vsub.f32 %v617_v63, %v623_v3 }
 0x392   : > { %v628_v5 = vmul.f32 1.442695, %v625_v4 }
 0x394   : > { %931 = vpow2.f32 %v628_v5 }
 0x39a   : > { %v930_v6 = vpop.eup %929 }
 0x39b   : > { %630 = vadd.xlane.f32.xlu1 %v930_v6 }
 0x39e   : > { %v932_v7 = vpop.eup %931 }
 0x39f   : > { %632 = vadd.xlane.f32.xlu1 %v932_v7 }
 0x428   : > { %v631_v8 = vpop.xlane.xlu1 %630 }
 0x429   : > { %933 = vrcp.f32 %v631_v8 }
 0x42c   : > { %v633_v9 = vpop.xlane.xlu1 %632 }
 0x42d   : > { %935 = vrcp.f32 %v633_v9 }
 0x433   : > { %v934_v10 = vpop.eup %933 }
 0x434   : > { %v636_v11 = vmul.f32 %v934_v10, %v930_v6 }
 0x436   : > { %638 = vst [vmem:[%s302_s16] sm:$0xff] %v636_v11 }
 0x437   : > { %v936_v12 = vpop.eup %935 }
 0x438   : > { %v637_v13 = vmul.f32 %v936_v12, %v932_v7 }
 0x43a   : > { %639 = vst [vmem:[%s302_s16 + $0x8] sm:$0xff] %v637_v13 }
 0x43b   : > { %1006 = shalt.err (!%p1003_p11)
}
 0x43c   : > { %s1007_s29 = scalar_lea.hbm %s1299_s17, 256  ;;  %s1011_s15 = scalar_lea.hbm %s1351_s7, 512 }
 0x43d   : > { %p1008_p13 = scmp.ne.s32.totalorder %s1299_s17, %s1007_s29  ;;  %p1012_p6 = scmp.lt.u32.totalorder %s1299_s17, %s1351_s7 }
 0x43e   : > { %p1013_p9 = scmp.lt.u32.totalorder %s1011_s15, %s1007_s29  ;;  %p1015_p10 = scmp.lt.u32.totalorder %s1007_s29, %s1299_s17 }
 0x43f   : > { %p1009_p5 = pnand %p1008_p13, %p1365_p1 }
 0x440   : > { %p1014_p12 = por %p1013_p9, %p1012_p6 }
 0x441   : > { %p1010_p0 = pneg %p1009_p5 }
 0x442   : > { %p1016_p2 = por %p1015_p10, %p1014_p12 }
 0x444   : > { %p1017_p3 = pnand %p1016_p2, %p1010_p0 }
 0x446   : > { %1020 = shalt.err (!%p1017_p3)
}
 0x447   : > { %s1072_s16 = smov 128   ;;  %s1073_s18 = smov 8  }
 0x448   : > { %850 = dma.vmem_to_hbm [thread:$0]  (%p1365_p1), %s1301_s13, 256, %s1299_s17, %s1303_s20, %s1072_s16, %s1072_s16, %s1073_s18  }
 0x449 PF: > { %p867_p4 = scmp.ge.s32.totalorder %s1063_s27, 2  ;;  %s669_s14 = sand.u32 1, %s1051_s24  }
 0x44a   : > { %p1366_p7 = scmp.ne.s32.totalorder %s1357_s12, 0  ;;  %s670_s21 = scalar_lea.sflag [#allocation4], %s669_s14 }
 0x44c   : > { %p860_p8 = pnand %p867_p4, %p1366_p7 }
 0x44e   : > { %1046 = dma.done.wait (!%p860_p8), %s670_s21, 256  }
 0x44f   : > { %1048 = vsyncadd (!%p860_p8), %s670_s21, 4294967040  ;;  %s1367_s28 = sld [smem:[#allocation11_spill]]  ;;  %p19_p11 = scmp.ge.s32.totalorder %s1139_s30, 4  }
 0x450   : > { %s1368_s24 = smov %s1055_s25  ;;  %s1369_s25 = smov %s1059_s26 }
 0x451   : > { %s1371_s27 = smov %s1139_s30  ;;  %21 = sbr.rel (!%p19_p11) target bundleno = 5 (0x5), region = 92 }
 0x455   : > { %s1370_s26 = smov %s1367_s28 }
 0x458   :  { %675 = vsyncpa [#allocation3], 1 }
 0x459   :  { %677 = vsyncpa [#allocation3 + $0x1], 1 }
 0x45a   :  { %678 = vsyncpa [#allocation6], 1 }
 0x45b   :  { %679 = vsyncpa [#allocation4], 1 }
 0x45c   :  { %681 = vsyncpa [#allocation4 + $0x1], 1 }

</bundles_post_ra>
